<compile_context>
chip_gen: v6e
topology: v6e:2x2x1
jax: 0.10.0
libtpu: 0.0.40
codegen_flags: <defaults>
</compile_context>

<pallas_src>
import functools

import jax
import jax.numpy as jnp
from jax.experimental import pallas as pl
from jax.experimental.pallas import tpu as pltpu  # noqa: F401  (TPU backend import)

BN_EPS = 1e-5
LANE = 128


# ----------------------------- Pallas kernel ------------------------------- #

def make_fused_mlp_kernel(num_hidden):
    """Fused (Linear -> BN(batch stats) -> ReLU) x num_hidden -> Linear head."""

    def kernel(*refs):
        # refs = (x, [w, gamma, beta] * num_hidden, head_w, head_b, out)
        x_ref = refs[0]
        o_ref = refs[-1]

        h = x_ref[...]
        i = 1
        for _ in range(num_hidden):
            w_ref, g_ref, b_ref = refs[i], refs[i + 1], refs[i + 2]
            i += 3
            # Linear (bias omitted: exactly cancelled by train-mode BatchNorm).
            y = jnp.dot(h, w_ref[...], preferred_element_type=jnp.float32)
            # BatchNorm1d, training-mode batch statistics (biased variance), one pass.
            mean = jnp.mean(y, axis=0, keepdims=True)
            msq = jnp.mean(y * y, axis=0, keepdims=True)
            var = jnp.maximum(msq - mean * mean, 0.0)
            scale = g_ref[...] * jax.lax.rsqrt(var + BN_EPS)
            shift = b_ref[...] - mean * scale
            # Fused affine + ReLU (single VPU pass).
            h = jnp.maximum(y * scale + shift, 0.0)

        hw_ref, hb_ref = refs[i], refs[i + 1]
        o_ref[...] = (
            jnp.dot(h, hw_ref[...], preferred_element_type=jnp.float32) + hb_ref[...]
        )

    return kernel


# ------------------------------- wrappers ---------------------------------- #

def _full_spec(shape):
    # Whole-array block (no grid): all tensors are small enough to live in VMEM at once.
    return pl.BlockSpec(shape, lambda: tuple(0 for _ in shape))


def _round_up(n, m=LANE):
    return ((n + m - 1) // m) * m


def mlp_forward(padded_params, x, num_classes):
    """x: (B, C, H, W) -> logits (B, num_classes), via one fused Pallas kernel."""
    B = x.shape[0]
    h = x.reshape(B, -1).astype(jnp.float32)

    inputs = [h]
    in_specs = [_full_spec(h.shape)]
    for (w_p, g_p, b_p) in padded_params["hidden"]:
        for arr in (w_p, g_p, b_p):
            inputs.append(arr)
            in_specs.append(_full_spec(arr.shape))
    for arr in (padded_params["head_w"], padded_params["head_b"]):
        inputs.append(arr)
        in_specs.append(_full_spec(arr.shape))

    out_cols = padded_params["head_w"].shape[1]  # lane-dense (multiple of 128)
    out = pl.pallas_call(
        make_fused_mlp_kernel(len(padded_params["hidden"])),
        out_shape=jax.ShapeDtypeStruct((B, out_cols), jnp.float32),
        in_specs=in_specs,
        out_specs=_full_spec((B, out_cols)),
    )(*inputs)
    # Slice the zero-padded logits back to the real class count.
    return out[:, :num_classes]


# --------------------------- parameter creation ----------------------------- #

def init_mlp_params(key, input_size, num_classes, depth, width):
    """Deterministic init mirroring PyTorch defaults:
       Linear: U(-1/sqrt(fan_in), 1/sqrt(fan_in)) for weight and bias,
       BatchNorm1d: gamma=1, beta=0."""
    sizes = [(input_size, width)]
    for _ in range(depth - 2):
        sizes.append((width, width))
    params = {"hidden": []}
    for (fan_in, fan_out) in sizes:
        key, kw, kb = jax.random.split(key, 3)
        bound = 1.0 / jnp.sqrt(jnp.float32(fan_in))
        w_t = jax.random.uniform(kw, (fan_in, fan_out), jnp.float32, -bound, bound)
        b = jax.random.uniform(kb, (fan_out,), jnp.float32, -bound, bound)
        gamma = jnp.ones((fan_out,), jnp.float32)
        beta = jnp.zeros((fan_out,), jnp.float32)
        params["hidden"].append((w_t, b, gamma, beta))
    key, kw, kb = jax.random.split(key, 3)
    bound = 1.0 / jnp.sqrt(jnp.float32(width))
    params["head_w"] = jax.random.uniform(
        kw, (width, num_classes), jnp.float32, -bound, bound)
    params["head_b"] = jax.random.uniform(kb, (num_classes,), jnp.float32, -bound, bound)
    return params


def pad_params(params):
    """Zero-pad feature dims up to 128 lanes.

    Padding is exact: padded activation columns are identically 0 after BN+ReLU
    (their pre-activations are 0 for every row), and padded weight rows are 0,
    so they never contribute to the next layer. Hidden Linear biases are dropped
    (cancelled by train-mode BatchNorm)."""
    padded = {"hidden": []}
    prev_cols = None  # padded width of the running activation; None = raw input width
    for (w_t, _b, gamma, beta) in params["hidden"]:
        in_f, out_f = w_t.shape
        rows = in_f if prev_cols is None else prev_cols
        cols = _round_up(out_f)
        w_p = jnp.zeros((rows, cols), jnp.float32).at[:in_f, :out_f].set(w_t)
        g_p = jnp.zeros((1, cols), jnp.float32).at[0, :out_f].set(gamma)
        b_p = jnp.zeros((1, cols), jnp.float32).at[0, :out_f].set(beta)
        padded["hidden"].append((w_p, g_p, b_p))
        prev_cols = cols
    w, b = params["head_w"], params["head_b"]
    in_f, out_f = w.shape
    rows = in_f if prev_cols is None else prev_cols
    cols = _round_up(out_f)
    padded["head_w"] = jnp.zeros((rows, cols), jnp.float32).at[:in_f, :out_f].set(w)
    padded["head_b"] = jnp.zeros((1, cols), jnp.float32).at[0, :out_f].set(b)
    return padded


# ------------------------------ pure-JAX ref -------------------------------- #

def mlp_reference(params, x):
    """Literal translation of the PyTorch module (train-mode BN, with biases)."""
    B = x.shape[0]
    h = x.reshape(B, -1).astype(jnp.float32)
    for (w_t, b, gamma, beta) in params["hidden"]:
        y = h @ w_t + b
        mean = jnp.mean(y, axis=0, keepdims=True)
        var = jnp.mean((y - mean) ** 2, axis=0, keepdims=True)
        y = (y - mean) / jnp.sqrt(var + BN_EPS) * gamma + beta
        h = jnp.maximum(y, 0.0)
    return h @ params["head_w"] + params["head_b"]


# ----------------------------------- main ----------------------------------- #

if __name__ == "__main__":
    key = jax.random.PRNGKey(0)
    k_x, k_p = jax.random.split(key)

    # Small shapes consistent with the module: image input flattened to input_size.
    B, C, H, W = 8, 4, 8, 8            # batch >= 2 required for BatchNorm1d batch stats
    input_size = C * H * W             # 256
    num_classes = 10
    depth = 3                          # 2 hidden MLPLayers + final Linear head
    width = 32

    x = jax.random.normal(k_x, (B, C, H, W), jnp.float32)
    params = init_mlp_params(k_p, input_size, num_classes, depth, width)
    padded = pad_params(params)

    fwd = jax.jit(functools.partial(mlp_forward, num_classes=num_classes))
    out = jax.block_until_ready(fwd(padded, x))
    assert out.shape == (B, num_classes), out.shape

    # Correctness check against the literal (biased, two-pass) reference.
    ref = jax.block_until_ready(mlp_reference(params, x))
    err = float(jnp.max(jnp.abs(out - ref)))
    assert err < 2e-3, f"max abs error vs reference: {err}"

    print("KERNEL_OK")
</pallas_src>

<mosaic_0001>
module attributes {stable_mosaic.version = 11 : i64} {
  func.func @kernel(%arg0: memref<8x256xf32, #tpu.memory_space<vmem>>, %arg1: memref<256x128xf32, #tpu.memory_space<vmem>>, %arg2: memref<1x128xf32, #tpu.memory_space<vmem>>, %arg3: memref<1x128xf32, #tpu.memory_space<vmem>>, %arg4: memref<128x128xf32, #tpu.memory_space<vmem>>, %arg5: memref<1x128xf32, #tpu.memory_space<vmem>>, %arg6: memref<1x128xf32, #tpu.memory_space<vmem>>, %arg7: memref<128x128xf32, #tpu.memory_space<vmem>>, %arg8: memref<1x128xf32, #tpu.memory_space<vmem>>, %arg9: memref<8x128xf32, #tpu.memory_space<vmem>>) attributes {dimension_semantics = [], scalar_prefetch = 0 : i64, scratch_operands = 0 : i64, tpu.core_type = #tpu.core_type<tc>} {
    %c0 = arith.constant 0 : index
    %c0_0 = arith.constant 0 : index
    %0 = vector.load %arg0[%c0, %c0_0] : memref<8x256xf32, #tpu.memory_space<vmem>>, vector<8x256xf32>
    %c0_1 = arith.constant 0 : index
    %c0_2 = arith.constant 0 : index
    %1 = vector.load %arg1[%c0_1, %c0_2] : memref<256x128xf32, #tpu.memory_space<vmem>>, vector<256x128xf32>
    %cst = arith.constant dense<0.000000e+00> : vector<8x128xf32>
    %2 = tpu.matmul %0, %1, %cst {dimension_numbers = #tpu.dot_dimension_numbers<[1], [0], [0], [1], [0, 0, 1, 1], [], []>} : vector<8x256xf32>, vector<256x128xf32>, vector<8x128xf32> -> vector<8x128xf32>
    %cst_3 = arith.constant dense<0.000000e+00> : vector<128xf32>
    %3 = vector.multi_reduction <add>, %2, %cst_3 [0] : vector<8x128xf32> to vector<128xf32>
    %4 = vector.shape_cast %3 : vector<128xf32> to vector<1x128xf32>
    %cst_4 = arith.constant 8.000000e+00 : f32
    %5 = vector.broadcast %cst_4 : f32 to vector<1x128xf32>
    %6 = arith.divf %4, %5 : vector<1x128xf32>
    %7 = arith.mulf %2, %2 : vector<8x128xf32>
    %cst_5 = arith.constant dense<0.000000e+00> : vector<128xf32>
    %8 = vector.multi_reduction <add>, %7, %cst_5 [0] : vector<8x128xf32> to vector<128xf32>
    %9 = vector.shape_cast %8 : vector<128xf32> to vector<1x128xf32>
    %cst_6 = arith.constant 8.000000e+00 : f32
    %10 = vector.broadcast %cst_6 : f32 to vector<1x128xf32>
    %11 = arith.divf %9, %10 : vector<1x128xf32>
    %12 = arith.mulf %6, %6 : vector<1x128xf32>
    %13 = arith.subf %11, %12 : vector<1x128xf32>
    %cst_7 = arith.constant 0.000000e+00 : f32
    %14 = vector.broadcast %cst_7 : f32 to vector<1x128xf32>
    %15 = arith.maximumf %13, %14 : vector<1x128xf32>
    %c0_8 = arith.constant 0 : index
    %c0_9 = arith.constant 0 : index
    %16 = vector.load %arg2[%c0_8, %c0_9] : memref<1x128xf32, #tpu.memory_space<vmem>>, vector<1x128xf32>
    %cst_10 = arith.constant 9.99999974E-6 : f32
    %17 = vector.broadcast %cst_10 : f32 to vector<1x128xf32>
    %18 = arith.addf %15, %17 : vector<1x128xf32>
    %19 = math.rsqrt %18 : vector<1x128xf32>
    %20 = arith.mulf %16, %19 : vector<1x128xf32>
    %c0_11 = arith.constant 0 : index
    %c0_12 = arith.constant 0 : index
    %21 = vector.load %arg3[%c0_11, %c0_12] : memref<1x128xf32, #tpu.memory_space<vmem>>, vector<1x128xf32>
    %22 = arith.mulf %6, %20 : vector<1x128xf32>
    %23 = arith.subf %21, %22 : vector<1x128xf32>
    %24 = vector.broadcast %20 : vector<1x128xf32> to vector<8x128xf32>
    %25 = arith.mulf %2, %24 : vector<8x128xf32>
    %26 = vector.broadcast %23 : vector<1x128xf32> to vector<8x128xf32>
    %27 = arith.addf %25, %26 : vector<8x128xf32>
    %cst_13 = arith.constant 0.000000e+00 : f32
    %28 = vector.broadcast %cst_13 : f32 to vector<8x128xf32>
    %29 = arith.maximumf %27, %28 : vector<8x128xf32>
    %c0_14 = arith.constant 0 : index
    %c0_15 = arith.constant 0 : index
    %30 = vector.load %arg4[%c0_14, %c0_15] : memref<128x128xf32, #tpu.memory_space<vmem>>, vector<128x128xf32>
    %cst_16 = arith.constant dense<0.000000e+00> : vector<8x128xf32>
    %31 = tpu.matmul %29, %30, %cst_16 {dimension_numbers = #tpu.dot_dimension_numbers<[1], [0], [0], [1], [0, 0, 1, 1], [], []>} : vector<8x128xf32>, vector<128x128xf32>, vector<8x128xf32> -> vector<8x128xf32>
    %cst_17 = arith.constant dense<0.000000e+00> : vector<128xf32>
    %32 = vector.multi_reduction <add>, %31, %cst_17 [0] : vector<8x128xf32> to vector<128xf32>
    %33 = vector.shape_cast %32 : vector<128xf32> to vector<1x128xf32>
    %cst_18 = arith.constant 8.000000e+00 : f32
    %34 = vector.broadcast %cst_18 : f32 to vector<1x128xf32>
    %35 = arith.divf %33, %34 : vector<1x128xf32>
    %36 = arith.mulf %31, %31 : vector<8x128xf32>
    %cst_19 = arith.constant dense<0.000000e+00> : vector<128xf32>
    %37 = vector.multi_reduction <add>, %36, %cst_19 [0] : vector<8x128xf32> to vector<128xf32>
    %38 = vector.shape_cast %37 : vector<128xf32> to vector<1x128xf32>
    %cst_20 = arith.constant 8.000000e+00 : f32
    %39 = vector.broadcast %cst_20 : f32 to vector<1x128xf32>
    %40 = arith.divf %38, %39 : vector<1x128xf32>
    %41 = arith.mulf %35, %35 : vector<1x128xf32>
    %42 = arith.subf %40, %41 : vector<1x128xf32>
    %cst_21 = arith.constant 0.000000e+00 : f32
    %43 = vector.broadcast %cst_21 : f32 to vector<1x128xf32>
    %44 = arith.maximumf %42, %43 : vector<1x128xf32>
    %c0_22 = arith.constant 0 : index
    %c0_23 = arith.constant 0 : index
    %45 = vector.load %arg5[%c0_22, %c0_23] : memref<1x128xf32, #tpu.memory_space<vmem>>, vector<1x128xf32>
    %cst_24 = arith.constant 9.99999974E-6 : f32
    %46 = vector.broadcast %cst_24 : f32 to vector<1x128xf32>
    %47 = arith.addf %44, %46 : vector<1x128xf32>
    %48 = math.rsqrt %47 : vector<1x128xf32>
    %49 = arith.mulf %45, %48 : vector<1x128xf32>
    %c0_25 = arith.constant 0 : index
    %c0_26 = arith.constant 0 : index
    %50 = vector.load %arg6[%c0_25, %c0_26] : memref<1x128xf32, #tpu.memory_space<vmem>>, vector<1x128xf32>
    %51 = arith.mulf %35, %49 : vector<1x128xf32>
    %52 = arith.subf %50, %51 : vector<1x128xf32>
    %53 = vector.broadcast %49 : vector<1x128xf32> to vector<8x128xf32>
    %54 = arith.mulf %31, %53 : vector<8x128xf32>
    %55 = vector.broadcast %52 : vector<1x128xf32> to vector<8x128xf32>
    %56 = arith.addf %54, %55 : vector<8x128xf32>
    %cst_27 = arith.constant 0.000000e+00 : f32
    %57 = vector.broadcast %cst_27 : f32 to vector<8x128xf32>
    %58 = arith.maximumf %56, %57 : vector<8x128xf32>
    %c0_28 = arith.constant 0 : index
    %c0_29 = arith.constant 0 : index
    %59 = vector.load %arg7[%c0_28, %c0_29] : memref<128x128xf32, #tpu.memory_space<vmem>>, vector<128x128xf32>
    %cst_30 = arith.constant dense<0.000000e+00> : vector<8x128xf32>
    %60 = tpu.matmul %58, %59, %cst_30 {dimension_numbers = #tpu.dot_dimension_numbers<[1], [0], [0], [1], [0, 0, 1, 1], [], []>} : vector<8x128xf32>, vector<128x128xf32>, vector<8x128xf32> -> vector<8x128xf32>
    %c0_31 = arith.constant 0 : index
    %c0_32 = arith.constant 0 : index
    %61 = vector.load %arg8[%c0_31, %c0_32] : memref<1x128xf32, #tpu.memory_space<vmem>>, vector<1x128xf32>
    %62 = vector.broadcast %61 : vector<1x128xf32> to vector<8x128xf32>
    %63 = arith.addf %60, %62 : vector<8x128xf32>
    %c0_33 = arith.constant 0 : index
    %c0_34 = arith.constant 0 : index
    %64 = vector.load %arg9[%c0_33, %c0_34] : memref<8x128xf32, #tpu.memory_space<vmem>>, vector<8x128xf32>
    tpu.vector_store %arg9[%c0_33, %c0_34], %63 {strides = array<i32>} : memref<8x128xf32, #tpu.memory_space<vmem>>, vector<8x128xf32>,
    return
  }
}

</mosaic_0001>

<bundles_post_ra>
// kernel: mlp_forward.1
= control target key start
LH: loop header
LB: loop body
LE: loop exit
PB: predicated region body
PF: predicated region fallthrough
CT: control target
= control target key end

     0   :  { %14 = vsyncpa [#allocation3], 0  ;;  %s882_s0 = inlined_call_operand.vmem [shape: f32[8,256], index: 0, kind: input, shape index: {}]   ;;  %s883_s1 = inlined_call_operand.vmem [shape: f32[256,128], index: 1, kind: input, shape index: {}]   ;;  %s884_s2 = inlined_call_operand.vmem [shape: f32[1,128], index: 2, kind: input, shape index: {}]   ;;  %s885_s3 = inlined_call_operand.vmem [shape: f32[1,128], index: 3, kind: input, shape index: {}]   ;;  %s886_s4 = inlined_call_operand.hbm [shape: f32[128,128], index: 4, kind: input, shape index: {}]   ;;  %s887_s5 = inlined_call_operand.vmem [shape: f32[1,128], index: 5, kind: input, shape index: {}]   ;;  %s888_s6 = inlined_call_operand.vmem [shape: f32[1,128], index: 6, kind: input, shape index: {}]   ;;  %s889_s7 = inlined_call_operand.hbm [shape: f32[128,128], index: 7, kind: input, shape index: {}]   ;;  %s890_s8 = inlined_call_operand.vmem [shape: f32[1,128], index: 8, kind: input, shape index: {}]   ;;  %s891_s9 = inlined_call_operand.hbm [shape: f32[8,128], index: 9, kind: output, shape index: {}]  }
   0x1   :  { %15 = vsyncpa [#allocation6], 0 }
   0x2   :  { %16 = vsyncpa [#allocation4], 0  ;;  %s659_s30 = smov [#allocation2]  }
   0x3   :  { %s30_s10 = sshll.u32 %s659_s30, 4  ;;  %s31_s10 = int_to_ptr.vmem [resolvable:$true] %s30_s10 }
   0x4   :  { %s601_s11 = scalar_lea.vmem %s31_s10, 2048  ;;  %p606_p1 = scmp.lt.s32.totalorder %s31_s10, %s31_s10 }
   0x5   :  { %p602_p0 = scmp.ne.s32.totalorder %s31_s10, %s601_s11  ;;  %p607_p2 = scmp.lt.s32.totalorder %s601_s11, %s601_s11 }
   0x7   :  { %p608_p3 = por %p607_p2, %p606_p1 }
   0x9   :  { %p609_p4 = pnand %p608_p3, %p602_p0 }
   0xb   :  { %612 = shalt.err (!%p609_p4)
}
   0xc   :  { %s660_s12 = smov 128   ;;  %s661_s13 = smov 8  }
   0xd   :  { %36 = dma.hbm_to_vmem [thread:$0]  %s886_s4, 2048, %s31_s10, [#allocation3], %s660_s12, %s660_s12, %s661_s13  }
   0xe   :  { %s662_s16 = smov [#allocation5]  }
   0xf   :  { %s46_s17 = sshll.u32 %s662_s16, 4  ;;  %s47_s17 = int_to_ptr.vmem [resolvable:$true] %s46_s17 }
  0x10   :  { %s621_s18 = scalar_lea.vmem %s47_s17, 2048  ;;  %p626_p6 = scmp.lt.s32.totalorder %s47_s17, %s47_s17 }
  0x11   :  { %p622_p5 = scmp.ne.s32.totalorder %s47_s17, %s621_s18  ;;  %p627_p7 = scmp.lt.s32.totalorder %s621_s18, %s621_s18 }
  0x13   :  { %p628_p8 = por %p627_p7, %p626_p6 }
  0x15   :  { %p629_p9 = pnand %p628_p8, %p622_p5 }
  0x17   :  { %632 = shalt.err (!%p629_p9)
}
  0x18   :  { %52 = dma.hbm_to_vmem [thread:$0]  %s889_s7, 2048, %s47_s17, [#allocation6], %s660_s12, %s660_s12, %s661_s13  }
  0x19   :  { %653 = dma.done.wait [#allocation3], 2048  }
  0x1a   :  { %654 = vsyncadd [#allocation3], 4294965248 }
  0x1b   :  { %655 = dma.done.wait [#allocation6], 2048  }
  0x1c   :  { %656 = vsyncadd [#allocation6], 4294965248  ;;  %v94_v0 = vld [vmem:[%s883_s1 + $0xf8] sm:$0xff]  ;;  %v93_v2 = vld [vmem:[%s883_s1 + $0xf0] sm:$0xff]  ;;  %v663_v35 = vmov 0.0   ;;  %vm664_vm0 = vmmov 0  }
  0x1d   :  { %v78_v1 = vld [vmem:[%s883_s1 + $0x78] sm:$0xff]  ;;  %443 = vmatprep.subr.mxu0 %v94_v0  ;;  %v77_v3 = vld [vmem:[%s883_s1 + $0x70] sm:$0xff]  ;;  %v92_v4 = vld [vmem:[%s883_s1 + $0xe8] sm:$0xff]  ;;  %512 = vmatprep.subr.mxu1 %v663_v35 }
  0x1e   :  { %444 = vmatpush3.msra.mxu0 %v78_v1  ;;  %v76_v5 = vld [vmem:[%s883_s1 + $0x68] sm:$0xff]  ;;  %v91_v6 = vld [vmem:[%s883_s1 + $0xe0] sm:$0xff]  ;;  %v90_v8 = vld [vmem:[%s883_s1 + $0xd8] sm:$0xff]  ;;  %544 = vmatprep.mubr.msk.f32.mxu1 %vm664_vm0, %v663_v35 }
  0x1f   :  { %445 = vmatprep.subr.mxu0 %v93_v2  ;;  %v75_v7 = vld [vmem:[%s883_s1 + $0x60] sm:$0xff]  ;;  %v74_v9 = vld [vmem:[%s883_s1 + $0x58] sm:$0xff]  ;;  %v89_v10 = vld [vmem:[%s883_s1 + $0xd0] sm:$0xff] }
  0x20   :  { %446 = vmatpush3.msra.mxu0 %v77_v3  ;;  %v73_v11 = vld [vmem:[%s883_s1 + $0x50] sm:$0xff]  ;;  %v88_v12 = vld [vmem:[%s883_s1 + $0xc8] sm:$0xff]  ;;  %v87_v15 = vld [vmem:[%s883_s1 + $0xc0] sm:$0xff] }
  0x21   :  { %447 = vmatprep.subr.mxu0 %v92_v4  ;;  %v62_v13 = vld [vmem:[%s882_s0 + $0x8] sm:$0xff]  ;;  %v71_v16 = vld [vmem:[%s883_s1 + $0x40] sm:$0xff]  ;;  %v86_v17 = vld [vmem:[%s883_s1 + $0xb8] sm:$0xff] }
  0x22   :  { %448 = vmatpush3.msra.mxu0 %v76_v5  ;;  %v72_v14 = vld [vmem:[%s883_s1 + $0x48] sm:$0xff]  ;;  %159 = vmatprep.mubr.f32.mxu0 %v62_v13  ;;  %v70_v18 = vld [vmem:[%s883_s1 + $0x38] sm:$0xff]  ;;  %v85_v19 = vld [vmem:[%s883_s1 + $0xb0] sm:$0xff] }
  0x23   :  { %449 = vmatprep.subr.mxu0 %v91_v6  ;;  %v69_v20 = vld [vmem:[%s883_s1 + $0x30] sm:$0xff]  ;;  %v84_v21 = vld [vmem:[%s883_s1 + $0xa8] sm:$0xff]  ;;  %v83_v23 = vld [vmem:[%s883_s1 + $0xa0] sm:$0xff] }
  0x24   :  { %450 = vmatpush3.msra.mxu0 %v75_v7  ;;  %v68_v22 = vld [vmem:[%s883_s1 + $0x28] sm:$0xff]  ;;  %v67_v24 = vld [vmem:[%s883_s1 + $0x20] sm:$0xff]  ;;  %v82_v25 = vld [vmem:[%s883_s1 + $0x98] sm:$0xff] }
  0x25   :  { %451 = vmatprep.subr.mxu0 %v90_v8  ;;  %v66_v26 = vld [vmem:[%s883_s1 + $0x18] sm:$0xff]  ;;  %v81_v27 = vld [vmem:[%s883_s1 + $0x90] sm:$0xff]  ;;  %v80_v29 = vld [vmem:[%s883_s1 + $0x88] sm:$0xff] }
  0x26   :  { %452 = vmatpush3.msra.mxu0 %v74_v9  ;;  %v65_v28 = vld [vmem:[%s883_s1 + $0x10] sm:$0xff]  ;;  %v64_v30 = vld [vmem:[%s883_s1 + $0x8] sm:$0xff]  ;;  %v79_v31 = vld [vmem:[%s883_s1 + $0x80] sm:$0xff]  ;;  %v192_v9 = vlaneseq }
  0x27   :  { %453 = vmatprep.subr.mxu0 %v89_v10  ;;  %v63_v32 = vld [vmem:[%s883_s1] sm:$0xff]  ;;  %v221_v34 = vld [vmem:[#allocation2 + $0x78] sm:$0xff]  ;;  %v220_v36 = vld [vmem:[#allocation2 + $0x70] sm:$0xff] }
  0x28   :  { %454 = vmatpush3.msra.mxu0 %v73_v11  ;;  %v61_v33 = vld [vmem:[%s882_s0] sm:$0xff]  ;;  %513 = vmatpush3.msra.mxu1 %v221_v34  ;;  %v219_v37 = vld [vmem:[#allocation2 + $0x68] sm:$0xff]  ;;  %v217_v39 = vld [vmem:[#allocation2 + $0x58] sm:$0xff]  ;;  %v193_v10 = vshrl.u32 %v192_v9, 7 }
  0x29   :  { %455 = vmatprep.subr.mxu0 %v88_v12  ;;  %514 = vmatprep.subr.mxu1 %v663_v35  ;;  %v218_v38 = vld [vmem:[#allocation2 + $0x60] sm:$0xff]  ;;  %v216_v40 = vld [vmem:[#allocation2 + $0x50] sm:$0xff]  ;;  %v215_v41 = vld [vmem:[#allocation2 + $0x48] sm:$0xff] }
  0x2a   :  { %456 = vmatpush3.msra.mxu0 %v72_v14  ;;  %515 = vmatpush3.msra.mxu1 %v220_v36  ;;  %v214_v42 = vld [vmem:[#allocation2 + $0x40] sm:$0xff]  ;;  %v213_v43 = vld [vmem:[#allocation2 + $0x38] sm:$0xff]  ;;  %v212_v44 = vld [vmem:[#allocation2 + $0x30] sm:$0xff]  ;;  %v846_v12 = vsub.s32 0, %v193_v10 }
  0x2b   :  { %457 = vmatprep.subr.mxu0 %v87_v15  ;;  %516 = vmatprep.subr.mxu1 %v663_v35  ;;  %v211_v45 = vld [vmem:[#allocation2 + $0x28] sm:$0xff]  ;;  %v210_v46 = vld [vmem:[#allocation2 + $0x20] sm:$0xff]  ;;  %v209_v47 = vld [vmem:[#allocation2 + $0x18] sm:$0xff] }
  0x2c   :  { %458 = vmatpush3.msra.mxu0 %v71_v16  ;;  %517 = vmatpush3.msra.mxu1 %v219_v37  ;;  %v208_v48 = vld [vmem:[#allocation2 + $0x10] sm:$0xff]  ;;  %v207_v49 = vld [vmem:[#allocation2 + $0x8] sm:$0xff]  ;;  %v206_v50 = vld [vmem:[#allocation2] sm:$0xff] }
  0x2d   :  { %459 = vmatprep.subr.mxu0 %v86_v17  ;;  %518 = vmatprep.subr.mxu1 %v663_v35  ;;  %v184_v11 = vld [vmem:[%s884_s2] sm:$0x1]  ;;  %v335_v36 = vld [vmem:[#allocation5 + $0x18] sm:$0xff]  ;;  %v334_v37 = vld [vmem:[#allocation5 + $0x10] sm:$0xff] }
  0x2e   :  { %460 = vmatpush3.msra.mxu0 %v70_v18  ;;  %519 = vmatpush3.msra.mxu1 %v218_v38  ;;  %v188_v15 = vld [vmem:[%s885_s3] sm:$0x1]  ;;  %v333_v38 = vld [vmem:[#allocation5 + $0x8] sm:$0xff] }
  0x2f   :  { %461 = vmatprep.subr.mxu0 %v85_v19  ;;  %520 = vmatprep.subr.mxu1 %v663_v35  ;;  %v336_v34 = vld [vmem:[#allocation5 + $0x20] sm:$0xff] }
  0x30   :  { %462 = vmatpush3.msra.mxu0 %v69_v20  ;;  %521 = vmatpush3.msra.mxu1 %v217_v39  ;;  %v332_v39 = vld [vmem:[#allocation5] sm:$0xff] }
  0x31   :  { %463 = vmatprep.subr.mxu0 %v84_v21  ;;  %522 = vmatprep.subr.mxu1 %v663_v35 }
  0x32   :  { %464 = vmatpush3.msra.mxu0 %v68_v22  ;;  %523 = vmatpush3.msra.mxu1 %v216_v40 }
  0x33   :  { %465 = vmatprep.subr.mxu0 %v83_v23  ;;  %524 = vmatprep.subr.mxu1 %v663_v35  ;;  %v347_v23 = vld [vmem:[#allocation5 + $0x78] sm:$0xff] }
  0x34   :  { %466 = vmatpush3.msra.mxu0 %v67_v24  ;;  %525 = vmatpush3.msra.mxu1 %v215_v41  ;;  %v346_v24 = vld [vmem:[#allocation5 + $0x70] sm:$0xff] }
  0x35   :  { %467 = vmatprep.subr.mxu0 %v82_v25  ;;  %526 = vmatprep.subr.mxu1 %v663_v35  ;;  %v345_v25 = vld [vmem:[#allocation5 + $0x68] sm:$0xff] }
  0x36   :  { %468 = vmatpush3.msra.mxu0 %v66_v26  ;;  %527 = vmatpush3.msra.mxu1 %v214_v42  ;;  %v344_v26 = vld [vmem:[#allocation5 + $0x60] sm:$0xff] }
  0x37   :  { %469 = vmatprep.subr.mxu0 %v81_v27  ;;  %528 = vmatprep.subr.mxu1 %v663_v35  ;;  %v343_v27 = vld [vmem:[#allocation5 + $0x58] sm:$0xff] }
  0x38   :  { %470 = vmatpush3.msra.mxu0 %v65_v28  ;;  %529 = vmatpush3.msra.mxu1 %v213_v43  ;;  %v342_v28 = vld [vmem:[#allocation5 + $0x50] sm:$0xff] }
  0x39   :  { %471 = vmatprep.subr.mxu0 %v80_v29  ;;  %530 = vmatprep.subr.mxu1 %v663_v35  ;;  %v341_v29 = vld [vmem:[#allocation5 + $0x48] sm:$0xff] }
  0x3a   :  { %472 = vmatpush3.msra.mxu0 %v64_v30  ;;  %531 = vmatpush3.msra.mxu1 %v212_v44  ;;  %v340_v30 = vld [vmem:[#allocation5 + $0x40] sm:$0xff] }
  0x3b   :  { %473 = vmatprep.subr.mxu0 %v79_v31  ;;  %532 = vmatprep.subr.mxu1 %v663_v35  ;;  %v339_v31 = vld [vmem:[#allocation5 + $0x38] sm:$0xff] }
  0x3c   :  { %474 = vmatpush3.msra.mxu0 %v63_v32  ;;  %533 = vmatpush3.msra.mxu1 %v211_v45  ;;  %v338_v32 = vld [vmem:[#allocation5 + $0x30] sm:$0xff] }
  0x3d   :  { %160 = vmatmul.mubr.f32.vlgmr.msra.gmra.mxu0 %v61_v33  ;;  %547 = vmatprep.subr.mxu0 %v663_v35  ;;  %v337_v33 = vld [vmem:[#allocation5 + $0x28] sm:$0xff] }
  0x3e   :  { %579 = vmatprep.mubr.msk.f32.mxu0 %vm664_vm0, %v663_v35  ;;  %534 = vmatprep.subr.mxu1 %v663_v35 }
  0x3f   :  { %535 = vmatpush3.msra.mxu1 %v210_v46  ;;  %548 = vmatpush3.msra.mxu0 %v347_v23 }
  0x40   :  { %536 = vmatprep.subr.mxu1 %v663_v35  ;;  %549 = vmatprep.subr.mxu0 %v663_v35 }
  0x41   :  { %537 = vmatpush3.msra.mxu1 %v209_v47  ;;  %550 = vmatpush3.msra.mxu0 %v346_v24 }
  0x42   :  { %538 = vmatprep.subr.mxu1 %v663_v35  ;;  %551 = vmatprep.subr.mxu0 %v663_v35 }
  0x43   :  { %539 = vmatpush3.msra.mxu1 %v208_v48  ;;  %552 = vmatpush3.msra.mxu0 %v345_v25 }
  0x44   :  { %540 = vmatprep.subr.mxu1 %v663_v35  ;;  %553 = vmatprep.subr.mxu0 %v663_v35 }
  0x45   :  { %541 = vmatpush3.msra.mxu1 %v207_v49  ;;  %554 = vmatpush3.msra.mxu0 %v344_v26 }
  0x46   :  { %542 = vmatprep.subr.mxu1 %v663_v35  ;;  %555 = vmatprep.subr.mxu0 %v663_v35 }
  0x47   :  { %543 = vmatpush3.msra.mxu1 %v206_v50  ;;  %556 = vmatpush3.msra.mxu0 %v343_v27 }
  0x48   :  { %557 = vmatprep.subr.mxu0 %v663_v35 }
  0x49   :  { %558 = vmatpush3.msra.mxu0 %v342_v28 }
  0x4a   :  { %559 = vmatprep.subr.mxu0 %v663_v35 }
  0x4b   :  { %560 = vmatpush3.msra.mxu0 %v341_v29 }
  0x4c   :  { %561 = vmatprep.subr.mxu0 %v663_v35 }
  0x4d   :  { %562 = vmatpush3.msra.mxu0 %v340_v30 }
  0x4e   :  { %563 = vmatprep.subr.mxu0 %v663_v35 }
  0x4f   :  { %564 = vmatpush3.msra.mxu0 %v339_v31 }
  0x50   :  { %565 = vmatprep.subr.mxu0 %v663_v35 }
  0x51   :  { %566 = vmatpush3.msra.mxu0 %v338_v32 }
  0x52   :  { %567 = vmatprep.subr.mxu0 %v663_v35 }
  0x53   :  { %568 = vmatpush3.msra.mxu0 %v337_v33 }
  0x54   :  { %569 = vmatprep.subr.mxu0 %v663_v35 }
  0x55   :  { %570 = vmatpush3.msra.mxu0 %v336_v34 }
  0x56   :  { %571 = vmatprep.subr.mxu0 %v663_v35 }
  0x57   :  { %572 = vmatpush3.msra.mxu0 %v335_v36 }
  0x58   :  { %573 = vmatprep.subr.mxu0 %v663_v35 }
  0x59   :  { %574 = vmatpush3.msra.mxu0 %v334_v37 }
  0x5a   :  { %575 = vmatprep.subr.mxu0 %v663_v35 }
  0x5b   :  { %576 = vmatpush3.msra.mxu0 %v333_v38 }
  0x5c   :  { %577 = vmatprep.subr.mxu0 %v663_v35 }
  0x5d   :  { %578 = vmatpush3.msra.mxu0 %v332_v39 }
  0xfd   :  { %v475_v51 = vpop.f32.mrf.mxu0 }
  0xff   :  { %v476_v52 = vpop.f32.mrf.mxu0 }
 0x100   :  { %v477_v53 = vadd.f32 %v476_v52, %v475_v51 }
 0x102   :  { %v165_v54 = vrot.slane %v477_v53, 4  ;;  %v173_v55 = vmul.f32 %v477_v53, %v477_v53 }
 0x104   :  { %v166_v56 = vadd.f32 %v477_v53, %v165_v54  ;;  %v174_v57 = vrot.slane %v173_v55, 4 }
 0x106   :  { %v167_v58 = vrot.slane %v166_v56, 2  ;;  %v175_v59 = vadd.f32 %v174_v57, %v173_v55 }
 0x108   :  { %v168_v60 = vadd.f32 %v167_v58, %v166_v56  ;;  %v176_v61 = vrot.slane %v175_v59, 2 }
 0x10a   :  { %v169_v62 = vrot.slane %v168_v60, 1  ;;  %v177_v63 = vadd.f32 %v176_v61, %v175_v59 }
 0x10c   :  { %v170_v0 = vadd.f32 %v169_v62, %v168_v60  ;;  %v178_v1 = vrot.slane %v177_v63, 1  ;;  %v310_v60 = vld [vmem:[%s887_s5] sm:$0x1]  ;;  %s665_s5 = smov [#allocation7]  }
 0x10d   :  { %s432_s25 = sshll.u32 %s665_s5, 4  ;;  %s433_s25 = int_to_ptr.vmem [resolvable:$true] %s432_s25 }
 0x10e   :  { %v179_v2 = vadd.f32 %v178_v1, %v177_v63  ;;  %v172_v3 = vmul.f32 0.125, %v170_v0  ;;  %v314_v63 = vld [vmem:[%s888_s6] sm:$0x1]  ;;  %s633_s6 = scalar_lea.vmem %s433_s25, 128  ;;  %p638_p11 = scmp.lt.s32.totalorder %s433_s25, %s433_s25 }
 0x10f   :  { %p634_p10 = scmp.ne.s32.totalorder %s433_s25, %s633_s6  ;;  %p639_p12 = scmp.lt.s32.totalorder %s633_s6, %s633_s6 }
 0x110   :  { %v180_v4 = vmul.f32 0.125, %v179_v2  ;;  %v181_v5 = vmul.f32 %v172_v3, %v172_v3 }
 0x111   :  { %p640_p13 = por %p639_p12, %p638_p11 }
 0x112   :  { %v182_v6 = vsub.f32 %v180_v4, %v181_v5 }
 0x113   :  { %p641_p0 = pnand %p640_p13, %p634_p10 }
 0x114   :  { %v183_v7 = vmax.f32 %v182_v6, 0.0 }
 0x116   :  { %v185_v8 = vadd.f32 1e-05, %v183_v7  ;;  %v442_v7 = vld [vmem:[%s890_s8] ss:$0 sm:$0xff] }
 0x118   :  { %589 = vrsqrt.f32 %v185_v8 }
 0x125   :  { %v590_v13 = vpop.eup %589 }
 0x126   :  { %v187_v14 = vmul.f32 %v590_v13, %v184_v11 }
 0x128   :  { %v189_v16 = vmul.f32 %v187_v14, %v172_v3  ;;  %v195_v17 = vrot.slane %v187_v14, %v846_v12 }
 0x12a   :  { %v190_v18 = vsub.f32 %v188_v15, %v189_v16  ;;  %v197_v19 = vmul.f32 %v477_v53, %v195_v17 }
 0x12c   :  { %v202_v20 = vrot.slane %v190_v18, %v846_v12 }
 0x12e   :  { %v204_v21 = vadd.f32 %v202_v20, %v197_v19 }
 0x130   :  { %v205_v22 = vmax.f32 %v204_v21, 0.0 }
 0x132   :  { %545 = vmatmul.mubr.f32.vlgmr.msra.gmra.mxu1 %v205_v22 }
 0x1f2   :  { %v288_v40 = vpop.f32.mrf.mxu1 }
 0x1f3   :  { %v292_v41 = vrot.slane %v288_v40, 4  ;;  %v299_v42 = vmul.f32 %v288_v40, %v288_v40 }
 0x1f4   :  { %v546_v43 = vpop.f32.mrf.mxu1 }
 0x1f5   :  { %v293_v44 = vadd.f32 %v292_v41, %v288_v40  ;;  %v300_v45 = vrot.slane %v299_v42, 4 }
 0x1f7   :  { %v294_v46 = vrot.slane %v293_v44, 2  ;;  %v301_v47 = vadd.f32 %v300_v45, %v299_v42 }
 0x1f9   :  { %v295_v48 = vadd.f32 %v294_v46, %v293_v44  ;;  %v302_v49 = vrot.slane %v301_v47, 2 }
 0x1fb   :  { %v296_v50 = vrot.slane %v295_v48, 1  ;;  %v303_v51 = vadd.f32 %v302_v49, %v301_v47 }
 0x1fd   :  { %v297_v52 = vadd.f32 %v296_v50, %v295_v48  ;;  %v304_v53 = vrot.slane %v303_v51, 1 }
 0x1ff   :  { %v298_v54 = vmul.f32 0.125, %v297_v52  ;;  %v305_v55 = vadd.f32 %v304_v53, %v303_v51 }
 0x201   :  { %v306_v56 = vmul.f32 0.125, %v305_v55  ;;  %v307_v57 = vmul.f32 %v298_v54, %v298_v54 }
 0x203   :  { %v308_v35 = vsub.f32 %v306_v56, %v307_v57 }
 0x205   :  { %v309_v58 = vmax.f32 %v308_v35, 0.0 }
 0x207   :  { %v311_v59 = vadd.f32 1e-05, %v309_v58 }
 0x209   :  { %591 = vrsqrt.f32 %v311_v59 }
 0x216   :  { %v592_v61 = vpop.eup %591 }
 0x217   :  { %v313_v62 = vmul.f32 %v592_v61, %v310_v60 }
 0x219   :  { %v315_v0 = vmul.f32 %v313_v62, %v298_v54  ;;  %v321_v1 = vrot.slane %v313_v62, %v846_v12 }
 0x21b   :  { %v316_v2 = vsub.f32 %v314_v63, %v315_v0  ;;  %v323_v3 = vmul.f32 %v321_v1, %v288_v40 }
 0x21d   :  { %v328_v4 = vrot.slane %v316_v2, %v846_v12 }
 0x21f   :  { %v330_v5 = vadd.f32 %v328_v4, %v323_v3 }
 0x221   :  { %v331_v6 = vmax.f32 %v330_v5, 0.0 }
 0x223   :  { %580 = vmatmul.mubr.f32.vlgmr.msra.gmra.mxu0 %v331_v6 }
 0x2e3   :  { %v421_v8 = vpop.f32.mrf.mxu0 }
 0x2e4   :  { %v422_v9 = vadd.f32 %v442_v7, %v421_v8 }
 0x2e5   :  { %v581_v10 = vpop.f32.mrf.mxu0 }
 0x2e6   :  { %425 = vst [vmem:[#allocation7] sm:$0xff] %v422_v9 }
 0x2e7   :  { %644 = shalt.err (!%p641_p0)
}
 0x2e8   :  { %435 = dma.vmem_to_hbm [thread:$0]  %s433_s25, 128, %s891_s9, [#allocation4]  }
 0x2e9   :  { %657 = dma.done.wait [#allocation4], 128  }
 0x2ea   :  { %658 = vsyncadd [#allocation4], 4294967168 }
 0x2eb   :  { %439 = vsyncpa [#allocation3], 1 }
 0x2ec   :  { %440 = vsyncpa [#allocation6], 1 }
 0x2ed   :  { %441 = vsyncpa [#allocation4], 1 }

</bundles_post_ra>
